<compile_context>
chip_gen: v6e
topology: v6e:2x2x1
jax: 0.10.0
libtpu: 0.0.40
codegen_flags: <defaults>
</compile_context>

<pallas_src>
import jax
import jax.numpy as jnp
from jax import lax
from jax.experimental import pallas as pl
from jax.experimental.pallas import tpu as pltpu

NUM_CLASSES = 10
PADDED_CLASSES = 128    # lane-dense output width
NEG_BIG = -1e30         # mask value for padded logit columns (keeps log-softmax exact)


def mlp_kernel(x_ref,
               w1_ref, b1_ref,
               w2_ref, b2_ref,
               w3_ref, b3_ref,
               w4_ref, b4_ref,
               o_ref):
    # Layer 1: Linear(784, 256) + ReLU   (bf16 matmul operands, f32 accumulate)
    h = jnp.dot(x_ref[...], w1_ref[...], preferred_element_type=jnp.float32) + b1_ref[...]
    h = jnp.maximum(h, 0.0)
    # Layer 2: Linear(256, 128) + ReLU
    h = jnp.dot(h.astype(jnp.bfloat16), w2_ref[...],
                preferred_element_type=jnp.float32) + b2_ref[...]
    h = jnp.maximum(h, 0.0)
    # Layer 3: Linear(128, 64) + ReLU
    h = jnp.dot(h.astype(jnp.bfloat16), w3_ref[...],
                preferred_element_type=jnp.float32) + b3_ref[...]
    h = jnp.maximum(h, 0.0)
    # Layer 4: Linear(64, 128-padded)
    logits = jnp.dot(h.astype(jnp.bfloat16), w4_ref[...],
                     preferred_element_type=jnp.float32) + b4_ref[...]      # (TB, 128)

    # Mask the 118 padded columns so softmax over 128 lanes == softmax over the real 10.
    col = lax.broadcasted_iota(jnp.int32, logits.shape, dimension=1)
    logits = jnp.where(col < NUM_CLASSES, logits, NEG_BIG)

    # LogSoftmax(dim=1), numerically stable, all f32.
    m = jnp.max(logits, axis=-1, keepdims=True)
    shifted = logits - m
    lse = jnp.log(jnp.sum(jnp.exp(shifted), axis=-1, keepdims=True))
    o_ref[...] = (shifted - lse).astype(o_ref.dtype)


def mlp_forward(x, params, *, block_batch=256):
    """x: (B, 784) float32.  params: list of (W, b) with W as (in, out), b as (1, out)."""
    (w1, b1), (w2, b2), (w3, b3), (w4, b4) = params
    B, D = x.shape
    assert D == 784

    # Pad the classifier to a lane-dense 128-wide output (zeros; masking happens in-kernel).
    w4p = jnp.zeros((w4.shape[0], PADDED_CLASSES), w4.dtype).at[:, :NUM_CLASSES].set(w4)
    b4p = jnp.zeros((1, PADDED_CLASSES), b4.dtype).at[:, :NUM_CLASSES].set(b4)

    # bf16 matmul operands (halves HBM/VMEM traffic, 2x MXU rate on v6e/v7x);
    # biases stay f32 so the elementwise path is f32 end-to-end.
    xb = x.astype(jnp.bfloat16)
    w1b, w2b, w3b, w4b = (w.astype(jnp.bfloat16) for w in (w1, w2, w3, w4p))
    b1f, b2f, b3f, b4f = (b.astype(jnp.float32) for b in (b1, b2, b3, b4p))

    # Batch tile: multiple of 8 sublanes; default 256 fills the MXU on v6e/v7x.
    TB = min(block_batch, max(8, ((B + 7) // 8) * 8))
    Bp = pl.cdiv(B, TB) * TB
    if Bp != B:
        xb = jnp.pad(xb, ((0, Bp - B), (0, 0)))
    grid = (Bp // TB,)

    x_spec = pl.BlockSpec((TB, D), lambda i: (i, 0))
    out_spec = pl.BlockSpec((TB, PADDED_CLASSES), lambda i: (i, 0))

    def const_spec(arr):
        # Constant index_map -> block revisited every grid step, weights stay VMEM-resident.
        return pl.BlockSpec(arr.shape, lambda i: (0, 0))

    flops = 2 * Bp * (784 * 256 + 256 * 128 + 128 * 64 + 64 * PADDED_CLASSES)
    bytes_accessed = (xb.size * 2
                      + sum(w.size * 2 for w in (w1b, w2b, w3b, w4b))
                      + sum(b.size * 4 for b in (b1f, b2f, b3f, b4f))
                      + Bp * PADDED_CLASSES * 4)
    cost = pl.CostEstimate(flops=flops,
                           transcendentals=Bp * PADDED_CLASSES,
                           bytes_accessed=bytes_accessed)

    out = pl.pallas_call(
        mlp_kernel,
        out_shape=jax.ShapeDtypeStruct((Bp, PADDED_CLASSES), jnp.float32),
        grid=grid,
        in_specs=[x_spec,
                  const_spec(w1b), const_spec(b1f),
                  const_spec(w2b), const_spec(b2f),
                  const_spec(w3b), const_spec(b3f),
                  const_spec(w4b), const_spec(b4f)],
        out_specs=out_spec,
        compiler_params=pltpu.CompilerParams(
            dimension_semantics=("parallel",)),   # shards batch tiles across v7x's 2 TCs
        cost_estimate=cost,
    )(xb, w1b, b1f, w2b, b2f, w3b, b3f, w4b, b4f)

    return out[:B, :NUM_CLASSES]


def init_linear(key, fan_in, fan_out):
    """Deterministic init mimicking torch.nn.Linear default (uniform +-1/sqrt(fan_in)).
    Weight returned as (fan_in, fan_out); bias as (1, fan_out) for 2-D TPU layout."""
    kw, kb = jax.random.split(key)
    bound = 1.0 / jnp.sqrt(fan_in)
    w = jax.random.uniform(kw, (fan_in, fan_out), jnp.float32, -bound, bound)
    b = jax.random.uniform(kb, (1, fan_out), jnp.float32, -bound, bound)
    return w, b


def reference_forward(x, params):
    """Pure-JAX reference that mirrors the kernel's bf16-operand / f32-accumulate numerics."""
    h = x.astype(jnp.bfloat16)
    for i, (w, b) in enumerate(params):
        h = jnp.dot(h, w.astype(jnp.bfloat16),
                    preferred_element_type=jnp.float32) + b.astype(jnp.float32)
        if i < len(params) - 1:
            h = jnp.maximum(h, 0.0).astype(jnp.bfloat16)
    return jax.nn.log_softmax(h, axis=1)


if __name__ == "__main__":
    key = jax.random.PRNGKey(0)
    k_x, k1, k2, k3, k4 = jax.random.split(key, 5)

    B = 8
    x = jax.random.normal(k_x, (B, 784), dtype=jnp.float32)

    params = [
        init_linear(k1, 784, 256),
        init_linear(k2, 256, 128),
        init_linear(k3, 128, 64),
        init_linear(k4, 64, 10),
    ]

    out = mlp_forward(x, params)
    out = jax.block_until_ready(out)

    ref = reference_forward(x, params)
    assert out.shape == (B, 10)
    assert bool(jnp.allclose(out, ref, atol=2e-2, rtol=2e-2)), "mismatch vs reference"

    print("KERNEL_OK")
</pallas_src>

<mosaic_0001>
module attributes {stable_mosaic.version = 11 : i64} {
  func.func @mlp_kernel(%arg0: i32, %arg1: memref<8x784xbf16, #tpu.memory_space<vmem>>, %arg2: memref<784x256xbf16, #tpu.memory_space<vmem>>, %arg3: memref<1x256xf32, #tpu.memory_space<vmem>>, %arg4: memref<256x128xbf16, #tpu.memory_space<vmem>>, %arg5: memref<1x128xf32, #tpu.memory_space<vmem>>, %arg6: memref<128x64xbf16, #tpu.memory_space<vmem>>, %arg7: memref<1x64xf32, #tpu.memory_space<vmem>>, %arg8: memref<64x128xbf16, #tpu.memory_space<vmem>>, %arg9: memref<1x128xf32, #tpu.memory_space<vmem>>, %arg10: memref<8x128xf32, #tpu.memory_space<vmem>>) attributes {dimension_semantics = [#tpu.dimension_semantics<parallel>], iteration_bounds = array<i64: 1>, scalar_prefetch = 0 : i64, scratch_operands = 0 : i64, tpu.core_type = #tpu.core_type<tc>, window_params = [{transform_indices = @transform_0, window_bounds = array<i64: 8, 784>}, {pipeline_mode = #tpu.pipeline_mode<synchronous>, transform_indices = @transform_1, window_bounds = array<i64: 784, 256>}, {pipeline_mode = #tpu.pipeline_mode<synchronous>, transform_indices = @transform_2, window_bounds = array<i64: 1, 256>}, {pipeline_mode = #tpu.pipeline_mode<synchronous>, transform_indices = @transform_3, window_bounds = array<i64: 256, 128>}, {pipeline_mode = #tpu.pipeline_mode<synchronous>, transform_indices = @transform_4, window_bounds = array<i64: 1, 128>}, {pipeline_mode = #tpu.pipeline_mode<synchronous>, transform_indices = @transform_5, window_bounds = array<i64: 128, 64>}, {pipeline_mode = #tpu.pipeline_mode<synchronous>, transform_indices = @transform_6, window_bounds = array<i64: 1, 64>}, {pipeline_mode = #tpu.pipeline_mode<synchronous>, transform_indices = @transform_7, window_bounds = array<i64: 64, 128>}, {pipeline_mode = #tpu.pipeline_mode<synchronous>, transform_indices = @transform_8, window_bounds = array<i64: 1, 128>}, {transform_indices = @transform_9, window_bounds = array<i64: 8, 128>}]} {
    %c0 = arith.constant 0 : index
    %c0_0 = arith.constant 0 : index
    %0 = vector.load %arg1[%c0, %c0_0] : memref<8x784xbf16, #tpu.memory_space<vmem>>, vector<8x784xbf16>
    %c0_1 = arith.constant 0 : index
    %c0_2 = arith.constant 0 : index
    %1 = vector.load %arg2[%c0_1, %c0_2] : memref<784x256xbf16, #tpu.memory_space<vmem>>, vector<784x256xbf16>
    %cst = arith.constant dense<0.000000e+00> : vector<8x256xf32>
    %2 = tpu.matmul %0, %1, %cst {dimension_numbers = #tpu.dot_dimension_numbers<[1], [0], [0], [1], [0, 0, 1, 1], [], []>} : vector<8x784xbf16>, vector<784x256xbf16>, vector<8x256xf32> -> vector<8x256xf32>
    %c0_3 = arith.constant 0 : index
    %c0_4 = arith.constant 0 : index
    %3 = vector.load %arg3[%c0_3, %c0_4] : memref<1x256xf32, #tpu.memory_space<vmem>>, vector<1x256xf32>
    %4 = vector.broadcast %3 : vector<1x256xf32> to vector<8x256xf32>
    %5 = arith.addf %2, %4 : vector<8x256xf32>
    %cst_5 = arith.constant 0.000000e+00 : f32
    %6 = vector.broadcast %cst_5 : f32 to vector<8x256xf32>
    %7 = arith.maximumf %5, %6 : vector<8x256xf32>
    %8 = arith.truncf %7 : vector<8x256xf32> to vector<8x256xbf16>
    %c0_6 = arith.constant 0 : index
    %c0_7 = arith.constant 0 : index
    %9 = vector.load %arg4[%c0_6, %c0_7] : memref<256x128xbf16, #tpu.memory_space<vmem>>, vector<256x128xbf16>
    %cst_8 = arith.constant dense<0.000000e+00> : vector<8x128xf32>
    %10 = tpu.matmul %8, %9, %cst_8 {dimension_numbers = #tpu.dot_dimension_numbers<[1], [0], [0], [1], [0, 0, 1, 1], [], []>} : vector<8x256xbf16>, vector<256x128xbf16>, vector<8x128xf32> -> vector<8x128xf32>
    %c0_9 = arith.constant 0 : index
    %c0_10 = arith.constant 0 : index
    %11 = vector.load %arg5[%c0_9, %c0_10] : memref<1x128xf32, #tpu.memory_space<vmem>>, vector<1x128xf32>
    %12 = vector.broadcast %11 : vector<1x128xf32> to vector<8x128xf32>
    %13 = arith.addf %10, %12 : vector<8x128xf32>
    %cst_11 = arith.constant 0.000000e+00 : f32
    %14 = vector.broadcast %cst_11 : f32 to vector<8x128xf32>
    %15 = arith.maximumf %13, %14 : vector<8x128xf32>
    %16 = arith.truncf %15 : vector<8x128xf32> to vector<8x128xbf16>
    %c0_12 = arith.constant 0 : index
    %c0_13 = arith.constant 0 : index
    %17 = vector.load %arg6[%c0_12, %c0_13] : memref<128x64xbf16, #tpu.memory_space<vmem>>, vector<128x64xbf16>
    %cst_14 = arith.constant dense<0.000000e+00> : vector<8x64xf32>
    %18 = tpu.matmul %16, %17, %cst_14 {dimension_numbers = #tpu.dot_dimension_numbers<[1], [0], [0], [1], [0, 0, 1, 1], [], []>} : vector<8x128xbf16>, vector<128x64xbf16>, vector<8x64xf32> -> vector<8x64xf32>
    %c0_15 = arith.constant 0 : index
    %c0_16 = arith.constant 0 : index
    %19 = vector.load %arg7[%c0_15, %c0_16] : memref<1x64xf32, #tpu.memory_space<vmem>>, vector<1x64xf32>
    %20 = vector.broadcast %19 : vector<1x64xf32> to vector<8x64xf32>
    %21 = arith.addf %18, %20 : vector<8x64xf32>
    %cst_17 = arith.constant 0.000000e+00 : f32
    %22 = vector.broadcast %cst_17 : f32 to vector<8x64xf32>
    %23 = arith.maximumf %21, %22 : vector<8x64xf32>
    %24 = arith.truncf %23 : vector<8x64xf32> to vector<8x64xbf16>
    %c0_18 = arith.constant 0 : index
    %c0_19 = arith.constant 0 : index
    %25 = vector.load %arg8[%c0_18, %c0_19] : memref<64x128xbf16, #tpu.memory_space<vmem>>, vector<64x128xbf16>
    %cst_20 = arith.constant dense<0.000000e+00> : vector<8x128xf32>
    %26 = tpu.matmul %24, %25, %cst_20 {dimension_numbers = #tpu.dot_dimension_numbers<[1], [0], [0], [1], [0, 0, 1, 1], [], []>} : vector<8x64xbf16>, vector<64x128xbf16>, vector<8x128xf32> -> vector<8x128xf32>
    %c0_21 = arith.constant 0 : index
    %c0_22 = arith.constant 0 : index
    %27 = vector.load %arg9[%c0_21, %c0_22] : memref<1x128xf32, #tpu.memory_space<vmem>>, vector<1x128xf32>
    %28 = vector.broadcast %27 : vector<1x128xf32> to vector<8x128xf32>
    %29 = arith.addf %26, %28 : vector<8x128xf32>
    %30 = tpu.iota {dimensions = array<i32: 1>} : vector<8x128xi32>
    %c10_i32 = arith.constant 10 : i32
    %31 = vector.broadcast %c10_i32 : i32 to vector<8x128xi32>
    %32 = arith.cmpi slt, %30, %31 : vector<8x128xi32>
    %cst_23 = arith.constant -1.000000e+30 : f32
    %33 = vector.broadcast %cst_23 : f32 to vector<8x128xf32>
    %34 = arith.select %32, %29, %33 : vector<8x128xi1>, vector<8x128xf32>
    %cst_24 = arith.constant dense<0xFF800000> : vector<8xf32>
    %35 = vector.multi_reduction <maximumf>, %34, %cst_24 [1] : vector<8x128xf32> to vector<8xf32>
    %36 = vector.shape_cast %35 : vector<8xf32> to vector<8x1xf32>
    %37 = vector.broadcast %36 : vector<8x1xf32> to vector<8x128xf32>
    %38 = arith.subf %34, %37 : vector<8x128xf32>
    %39 = math.exp %38 : vector<8x128xf32>
    %cst_25 = arith.constant dense<0.000000e+00> : vector<8xf32>
    %40 = vector.multi_reduction <add>, %39, %cst_25 [1] : vector<8x128xf32> to vector<8xf32>
    %41 = vector.shape_cast %40 : vector<8xf32> to vector<8x1xf32>
    %42 = math.log %41 : vector<8x1xf32>
    %43 = vector.broadcast %42 : vector<8x1xf32> to vector<8x128xf32>
    %44 = arith.subf %38, %43 : vector<8x128xf32>
    %c0_26 = arith.constant 0 : index
    %c0_27 = arith.constant 0 : index
    %45 = vector.load %arg10[%c0_26, %c0_27] : memref<8x128xf32, #tpu.memory_space<vmem>>, vector<8x128xf32>
    tpu.vector_store %arg10[%c0_26, %c0_27], %44 {strides = array<i32>} : memref<8x128xf32, #tpu.memory_space<vmem>>, vector<8x128xf32>,
    return
  }
  func.func @transform_0(%arg0: i32) -> (i32, i32) {
    %c0_i32 = arith.constant 0 : i32
    %c0_i32_0 = arith.constant 0 : i32
    return %arg0, %c0_i32 : i32, i32
  }
  func.func @transform_1(%arg0: i32) -> (i32, i32) {
    %c0_i32 = arith.constant 0 : i32
    %c0_i32_0 = arith.constant 0 : i32
    %c0_i32_1 = arith.constant 0 : i32
    return %c0_i32, %c0_i32_0 : i32, i32
  }
  func.func @transform_2(%arg0: i32) -> (i32, i32) {
    %c0_i32 = arith.constant 0 : i32
    %c0_i32_0 = arith.constant 0 : i32
    %c0_i32_1 = arith.constant 0 : i32
    return %c0_i32, %c0_i32_0 : i32, i32
  }
  func.func @transform_3(%arg0: i32) -> (i32, i32) {
    %c0_i32 = arith.constant 0 : i32
    %c0_i32_0 = arith.constant 0 : i32
    %c0_i32_1 = arith.constant 0 : i32
    return %c0_i32, %c0_i32_0 : i32, i32
  }
  func.func @transform_4(%arg0: i32) -> (i32, i32) {
    %c0_i32 = arith.constant 0 : i32
    %c0_i32_0 = arith.constant 0 : i32
    %c0_i32_1 = arith.constant 0 : i32
    return %c0_i32, %c0_i32_0 : i32, i32
  }
  func.func @transform_5(%arg0: i32) -> (i32, i32) {
    %c0_i32 = arith.constant 0 : i32
    %c0_i32_0 = arith.constant 0 : i32
    %c0_i32_1 = arith.constant 0 : i32
    return %c0_i32, %c0_i32_0 : i32, i32
  }
  func.func @transform_6(%arg0: i32) -> (i32, i32) {
    %c0_i32 = arith.constant 0 : i32
    %c0_i32_0 = arith.constant 0 : i32
    %c0_i32_1 = arith.constant 0 : i32
    return %c0_i32, %c0_i32_0 : i32, i32
  }
  func.func @transform_7(%arg0: i32) -> (i32, i32) {
    %c0_i32 = arith.constant 0 : i32
    %c0_i32_0 = arith.constant 0 : i32
    %c0_i32_1 = arith.constant 0 : i32
    return %c0_i32, %c0_i32_0 : i32, i32
  }
  func.func @transform_8(%arg0: i32) -> (i32, i32) {
    %c0_i32 = arith.constant 0 : i32
    %c0_i32_0 = arith.constant 0 : i32
    %c0_i32_1 = arith.constant 0 : i32
    return %c0_i32, %c0_i32_0 : i32, i32
  }
  func.func @transform_9(%arg0: i32) -> (i32, i32) {
    %c0_i32 = arith.constant 0 : i32
    %c0_i32_0 = arith.constant 0 : i32
    return %arg0, %c0_i32 : i32, i32
  }
}

</mosaic_0001>

<bundles_post_ra>
// kernel: tpu_custom_call.1
= control target key start
LH: loop header
LB: loop body
LE: loop exit
PB: predicated region body
PF: predicated region fallthrough
CT: control target
= control target key end

     0   :  { %14 = vsyncpa [#allocation3], 0  ;;  %s1886_s0 = inlined_call_operand.vmem [shape: bf16[8,784], index: 0, kind: input, shape index: {}]   ;;  %s1887_s1 = inlined_call_operand.hbm [shape: bf16[784,256], index: 1, kind: input, shape index: {}]   ;;  %s1888_s2 = inlined_call_operand.vmem [shape: f32[1,256], index: 2, kind: input, shape index: {}]   ;;  %s1889_s3 = inlined_call_operand.hbm [shape: bf16[256,128], index: 3, kind: input, shape index: {}]   ;;  %s1890_s4 = inlined_call_operand.vmem [shape: f32[1,128], index: 4, kind: input, shape index: {}]   ;;  %s1891_s5 = inlined_call_operand.vmem [shape: bf16[128,64], index: 5, kind: input, shape index: {}]   ;;  %s1892_s6 = inlined_call_operand.vmem [shape: f32[1,64], index: 6, kind: input, shape index: {}]   ;;  %s1893_s7 = inlined_call_operand.vmem [shape: bf16[64,128], index: 7, kind: input, shape index: {}]   ;;  %s1894_s8 = inlined_call_operand.vmem [shape: f32[1,128], index: 8, kind: input, shape index: {}]   ;;  %s1895_s9 = inlined_call_operand.hbm [shape: f32[8,128], index: 9, kind: output, shape index: {}]  }
   0x1   :  { %15 = vsyncpa [#allocation6], 0 }
   0x2   :  { %16 = vsyncpa [#allocation4], 0  ;;  %s1734_s30 = smov [#allocation2]  }
   0x3   :  { %s24_s10 = sshll.u32 %s1734_s30, 4  ;;  %s25_s10 = int_to_ptr.vmem [resolvable:$true] %s24_s10 }
   0x4   :  { %s1676_s11 = scalar_lea.vmem %s25_s10, 12544  ;;  %p1681_p1 = scmp.lt.s32.totalorder %s25_s10, %s25_s10 }
   0x5   :  { %p1677_p0 = scmp.ne.s32.totalorder %s25_s10, %s1676_s11  ;;  %p1682_p2 = scmp.lt.s32.totalorder %s1676_s11, %s1676_s11 }
   0x7   :  { %p1683_p3 = por %p1682_p2, %p1681_p1 }
   0x9   :  { %p1684_p4 = pnand %p1683_p3, %p1677_p0 }
   0xb   :  { %1687 = shalt.err (!%p1684_p4)
}
   0xc   :  { %s1735_s12 = smov 128   ;;  %s1736_s13 = smov 8  }
   0xd   :  { %30 = dma.hbm_to_vmem [thread:$0]  %s1887_s1, 12544, %s25_s10, [#allocation3], %s1735_s12, %s1735_s12, %s1736_s13  }
   0xe   :  { %s1737_s16 = smov [#allocation5]  }
   0xf   :  { %s38_s17 = sshll.u32 %s1737_s16, 4  ;;  %s39_s17 = int_to_ptr.vmem [resolvable:$true] %s38_s17 }
  0x10   :  { %s1696_s18 = scalar_lea.vmem %s39_s17, 2048  ;;  %p1701_p6 = scmp.lt.s32.totalorder %s39_s17, %s39_s17 }
  0x11   :  { %p1697_p5 = scmp.ne.s32.totalorder %s39_s17, %s1696_s18  ;;  %p1702_p7 = scmp.lt.s32.totalorder %s1696_s18, %s1696_s18 }
  0x13   :  { %p1703_p8 = por %p1702_p7, %p1701_p6 }
  0x15   :  { %p1704_p9 = pnand %p1703_p8, %p1697_p5 }
  0x17   :  { %1707 = shalt.err (!%p1704_p9)
}
  0x18   :  { %s1738_s19 = smov 64   ;;  %s1739_s20 = smov 4  }
  0x19   :  { %44 = dma.hbm_to_vmem [thread:$0]  %s1889_s3, 2048, %s39_s17, [#allocation6], %s1738_s19, %s1738_s19, %s1739_s20  }
  0x1a   :  { %1728 = dma.done.wait [#allocation3], 12544  }
  0x1b   :  { %1729 = vsyncadd [#allocation3], 4294954752 }
  0x1c   :  { %1730 = dma.done.wait [#allocation6], 2048  }
  0x1d   :  { %1731 = vsyncadd [#allocation6], 4294965248  ;;  %v1482_v0 = vld [vmem:[#allocation2 + $0x74] ss:$8 sps:$4 sm:$0xff]   ;;  %v1484_v1 = vld [vmem:[#allocation2 + $0x70] ss:$8 sps:$4 sm:$0xff]  }
  0x1e   :  { %694 = vmatprep.subr.bf16.mxu0 %v1482_v0  ;;  %v1485_v2 = vld [vmem:[#allocation2 + $0x174] ss:$8 sps:$4 sm:$0xff]   ;;  %v1487_v3 = vld [vmem:[#allocation2 + $0x170] ss:$8 sps:$4 sm:$0xff]   ;;  %v1488_v4 = vld [vmem:[#allocation2 + $0x64] ss:$8 sps:$4 sm:$0xff]  }
  0x1f   :  { %695 = vmatpush1.bf16.msra.mxu0 %v1484_v1  ;;  %v1490_v5 = vld [vmem:[#allocation2 + $0x60] ss:$8 sps:$4 sm:$0xff]   ;;  %735 = vmatprep.subr.bf16.mxu1 %v1485_v2  ;;  %v1491_v6 = vld [vmem:[#allocation2 + $0x164] ss:$8 sps:$4 sm:$0xff]   ;;  %v1494_v8 = vld [vmem:[#allocation2 + $0x54] ss:$8 sps:$4 sm:$0xff]  }
  0x20   :  { %736 = vmatpush1.bf16.msra.mxu1 %v1487_v3  ;;  %696 = vmatprep.subr.bf16.mxu0 %v1488_v4  ;;  %v1493_v7 = vld [vmem:[#allocation2 + $0x160] ss:$8 sps:$4 sm:$0xff]   ;;  %v1496_v9 = vld [vmem:[#allocation2 + $0x50] ss:$8 sps:$4 sm:$0xff]   ;;  %v1497_v10 = vld [vmem:[#allocation2 + $0x154] ss:$8 sps:$4 sm:$0xff]  }
  0x21   :  { %737 = vmatprep.subr.bf16.mxu1 %v1491_v6  ;;  %v1500_v11 = vld [vmem:[#allocation2 + $0x44] ss:$8 sps:$4 sm:$0xff]   ;;  %v1499_v12 = vld [vmem:[#allocation2 + $0x150] ss:$8 sps:$4 sm:$0xff]   ;;  %v1502_v14 = vld [vmem:[#allocation2 + $0x40] ss:$8 sps:$4 sm:$0xff]  }
  0x22   :  { %v1503_v13 = vld [vmem:[#allocation2 + $0x144] ss:$8 sps:$4 sm:$0xff]   ;;  %v1506_v15 = vld [vmem:[#allocation2 + $0x34] ss:$8 sps:$4 sm:$0xff]   ;;  %v1505_v16 = vld [vmem:[#allocation2 + $0x140] ss:$8 sps:$4 sm:$0xff]  }
  0x23   :  { %697 = vmatpush1.bf16.msra.mxu0 %v1490_v5  ;;  %v1509_v17 = vld [vmem:[#allocation2 + $0x134] ss:$8 sps:$4 sm:$0xff]   ;;  %v1508_v18 = vld [vmem:[#allocation2 + $0x30] ss:$8 sps:$4 sm:$0xff]   ;;  %v1512_v19 = vld [vmem:[#allocation2 + $0x24] ss:$8 sps:$4 sm:$0xff]  }
  0x24   :  { %698 = vmatprep.subr.bf16.mxu0 %v1494_v8  ;;  %738 = vmatpush1.bf16.msra.mxu1 %v1493_v7  ;;  %v1511_v20 = vld [vmem:[#allocation2 + $0x130] ss:$8 sps:$4 sm:$0xff]   ;;  %v1515_v21 = vld [vmem:[#allocation2 + $0x124] ss:$8 sps:$4 sm:$0xff]   ;;  %v1514_v22 = vld [vmem:[#allocation2 + $0x20] ss:$8 sps:$4 sm:$0xff]  }
  0x25   :  { %739 = vmatprep.subr.bf16.mxu1 %v1497_v10  ;;  %v1518_v23 = vld [vmem:[#allocation2 + $0x14] ss:$8 sps:$4 sm:$0xff]   ;;  %v1517_v24 = vld [vmem:[#allocation2 + $0x120] ss:$8 sps:$4 sm:$0xff]   ;;  %v1520_v26 = vld [vmem:[#allocation2 + $0x10] ss:$8 sps:$4 sm:$0xff]  }
  0x26   :  { %v1521_v25 = vld [vmem:[#allocation2 + $0x114] ss:$8 sps:$4 sm:$0xff]   ;;  %v1524_v27 = vld [vmem:[#allocation2 + $0x4] ss:$8 sps:$4 sm:$0xff]   ;;  %v1523_v28 = vld [vmem:[#allocation2 + $0x110] ss:$8 sps:$4 sm:$0xff]  }
  0x27   :  { %699 = vmatpush1.bf16.msra.mxu0 %v1496_v9  ;;  %v1527_v29 = vld [vmem:[#allocation2 + $0x104] ss:$8 sps:$4 sm:$0xff]   ;;  %v1526_v30 = vld [vmem:[#allocation2] ss:$8 sps:$4 sm:$0xff]   ;;  %v1530_v31 = vld [vmem:[#allocation2 + $0xf4] ss:$8 sps:$4 sm:$0xff]  }
  0x28   :  { %700 = vmatprep.subr.bf16.mxu0 %v1500_v11  ;;  %740 = vmatpush1.bf16.msra.mxu1 %v1499_v12  ;;  %v1529_v32 = vld [vmem:[#allocation2 + $0x100] ss:$8 sps:$4 sm:$0xff]   ;;  %v1533_v33 = vld [vmem:[#allocation2 + $0x1f4] ss:$8 sps:$4 sm:$0xff]   ;;  %v1532_v34 = vld [vmem:[#allocation2 + $0xf0] ss:$8 sps:$4 sm:$0xff]  }
  0x29   :  { %741 = vmatprep.subr.bf16.mxu1 %v1503_v13  ;;  %v1536_v35 = vld [vmem:[#allocation2 + $0xe4] ss:$8 sps:$4 sm:$0xff]   ;;  %v1535_v36 = vld [vmem:[#allocation2 + $0x1f0] ss:$8 sps:$4 sm:$0xff]   ;;  %v1538_v38 = vld [vmem:[#allocation2 + $0xe0] ss:$8 sps:$4 sm:$0xff]  }
  0x2a   :  { %v1539_v37 = vld [vmem:[#allocation2 + $0x1e4] ss:$8 sps:$4 sm:$0xff]   ;;  %v1542_v39 = vld [vmem:[#allocation2 + $0xd4] ss:$8 sps:$4 sm:$0xff]   ;;  %v1541_v40 = vld [vmem:[#allocation2 + $0x1e0] ss:$8 sps:$4 sm:$0xff]  }
  0x2b   :  { %701 = vmatpush1.bf16.msra.mxu0 %v1502_v14  ;;  %v1545_v41 = vld [vmem:[#allocation2 + $0x1d4] ss:$8 sps:$4 sm:$0xff]   ;;  %v1544_v42 = vld [vmem:[#allocation2 + $0xd0] ss:$8 sps:$4 sm:$0xff]   ;;  %v1548_v43 = vld [vmem:[#allocation2 + $0xc4] ss:$8 sps:$4 sm:$0xff]  }
  0x2c   :  { %702 = vmatprep.subr.bf16.mxu0 %v1506_v15  ;;  %742 = vmatpush1.bf16.msra.mxu1 %v1505_v16  ;;  %v1547_v44 = vld [vmem:[#allocation2 + $0x1d0] ss:$8 sps:$4 sm:$0xff]   ;;  %v1551_v45 = vld [vmem:[#allocation2 + $0x1c4] ss:$8 sps:$4 sm:$0xff]   ;;  %v1550_v47 = vld [vmem:[#allocation2 + $0xc0] ss:$8 sps:$4 sm:$0xff]  }
  0x2d   :  { %743 = vmatprep.subr.bf16.mxu1 %v1509_v17  ;;  %v62_v46 = vld [vmem:[%s1886_s0] sm:$0xff]  ;;  %v1554_v49 = vld [vmem:[#allocation2 + $0xb4] ss:$8 sps:$4 sm:$0xff]   ;;  %v63_v50 = vld [vmem:[%s1886_s0 + $0x8] sm:$0xff]  ;;  %vm690_vm0 = vcmask 130048   ;;  %v1740_v16 = vmov 0  }
  0x2e   :  { %v1267_v48 = vcombine.high %v62_v46, %v62_v46  ;;  %v1553_v51 = vld [vmem:[#allocation2 + $0x1c0] ss:$8 sps:$4 sm:$0xff]   ;;  %v1269_v52 = vcombine.high %v63_v50, %v63_v50  ;;  %v1557_v53 = vld [vmem:[#allocation2 + $0x1b4] ss:$8 sps:$4 sm:$0xff]   ;;  %v1556_v54 = vld [vmem:[#allocation2 + $0xb0] ss:$8 sps:$4 sm:$0xff]   ;;  %v1266_v5 = vcombine.low %v62_v46, %v62_v46  ;;  %v1268_v7 = vcombine.low %v63_v50, %v63_v50 }
  0x2f   :  { %703 = vmatpush1.bf16.msra.mxu0 %v1508_v18  ;;  %v1560_v55 = vld [vmem:[#allocation2 + $0xa4] ss:$8 sps:$4 sm:$0xff]   ;;  %v1559_v56 = vld [vmem:[#allocation2 + $0x1b0] ss:$8 sps:$4 sm:$0xff]   ;;  %v1562_v58 = vld [vmem:[#allocation2 + $0xa0] ss:$8 sps:$4 sm:$0xff]  }
  0x30   :  { %704 = vmatprep.subr.bf16.mxu0 %v1512_v19  ;;  %744 = vmatpush1.bf16.msra.mxu1 %v1511_v20  ;;  %v1563_v57 = vld [vmem:[#allocation2 + $0x1a4] ss:$8 sps:$4 sm:$0xff]   ;;  %v1566_v59 = vld [vmem:[#allocation2 + $0x94] ss:$8 sps:$4 sm:$0xff]   ;;  %v1565_v60 = vld [vmem:[#allocation2 + $0x1a0] ss:$8 sps:$4 sm:$0xff]  }
  0x31   :  { %745 = vmatprep.subr.bf16.mxu1 %v1515_v21  ;;  %726 = vmatprep.mubr.bf16.mxu0 %v1267_v48  ;;  %v1569_v61 = vld [vmem:[#allocation2 + $0x194] ss:$8 sps:$4 sm:$0xff]   ;;  %v1568_v62 = vld [vmem:[#allocation2 + $0x90] ss:$8 sps:$4 sm:$0xff]   ;;  %v1572_v63 = vld [vmem:[#allocation2 + $0x84] ss:$8 sps:$4 sm:$0xff]  }
  0x32   :  { %767 = vmatprep.mubr.bf16.mxu1 %v1269_v52  ;;  %v1571_v0 = vld [vmem:[#allocation2 + $0x190] ss:$8 sps:$4 sm:$0xff]   ;;  %v1575_v1 = vld [vmem:[#allocation2 + $0x184] ss:$8 sps:$4 sm:$0xff]   ;;  %v1574_v2 = vld [vmem:[#allocation2 + $0x80] ss:$8 sps:$4 sm:$0xff]  }
  0x33   :  { %705 = vmatpush1.bf16.msra.mxu0 %v1514_v22  ;;  %v1582_v3 = vld [vmem:[#allocation2 + $0x274] ss:$8 sps:$4 sm:$0xff]   ;;  %v1579_v4 = vld [vmem:[#allocation2 + $0x180] ss:$8 sps:$4 sm:$0xff]   ;;  %v1580_v6 = vld [vmem:[#allocation2 + $0x270] ss:$8 sps:$4 sm:$0xff]  }
  0x34   :  { %706 = vmatprep.subr.bf16.mxu0 %v1518_v23  ;;  %746 = vmatpush1.bf16.msra.mxu1 %v1517_v24  ;;  %v1587_v8 = vld [vmem:[#allocation2 + $0x264] ss:$8 sps:$4 sm:$0xff]   ;;  %v1627_v10 = vld [vmem:[#allocation2 + $0x300] ss:$8 sps:$4 sm:$0xff]   ;;  %v1809_v12 = vld [vmem:[%s1886_s0 + $0x10] sm:$0xff]  ;;  %vm1742_vm1 = vmmov 0  }
  0x35   :  { %747 = vmatprep.subr.bf16.mxu1 %v1521_v25  ;;  %v1629_v9 = vld [vmem:[#allocation2 + $0x304] ss:$8 sps:$4 sm:$0xff]   ;;  %v1585_v11 = vld [vmem:[#allocation2 + $0x260] ss:$8 sps:$4 sm:$0xff]   ;;  %v1590_v13 = vld [vmem:[#allocation2 + $0x254] ss:$8 sps:$4 sm:$0xff]   ;;  %v1271_v14 = vcombine.high %v1809_v12, %v1809_v12 }
  0x36   :  { %v1588_v15 = vld [vmem:[#allocation2 + $0x250] ss:$8 sps:$4 sm:$0xff]   ;;  %v1593_v17 = vld [vmem:[#allocation2 + $0x244] ss:$8 sps:$4 sm:$0xff]   ;;  %v1591_v19 = vld [vmem:[#allocation2 + $0x240] ss:$8 sps:$4 sm:$0xff]  }
  0x37   :  { %707 = vmatpush1.bf16.msra.mxu0 %v1520_v26  ;;  %v1633_v18 = vld [vmem:[%s1886_s0 + $0x18] ss:$0 sps:$4 sm:$0xff]   ;;  %v1596_v20 = vld [vmem:[#allocation2 + $0x234] ss:$8 sps:$4 sm:$0xff]   ;;  %v1599_v22 = vld [vmem:[#allocation2 + $0x224] ss:$8 sps:$4 sm:$0xff]  }
  0x38   :  { %708 = vmatprep.subr.bf16.mxu0 %v1524_v27  ;;  %748 = vmatpush1.bf16.msra.mxu1 %v1523_v28  ;;  %v1594_v21 = vld [vmem:[#allocation2 + $0x230] ss:$8 sps:$4 sm:$0xff]   ;;  %v1597_v23 = vld [vmem:[#allocation2 + $0x220] ss:$8 sps:$4 sm:$0xff]   ;;  %v1602_v24 = vld [vmem:[#allocation2 + $0x214] ss:$8 sps:$4 sm:$0xff]  }
  0x39   :  { %749 = vmatprep.subr.bf16.mxu1 %v1527_v29  ;;  %v1600_v25 = vld [vmem:[#allocation2 + $0x210] ss:$8 sps:$4 sm:$0xff]   ;;  %v1605_v26 = vld [vmem:[#allocation2 + $0x204] ss:$8 sps:$4 sm:$0xff]   ;;  %v1603_v27 = vld [vmem:[#allocation2 + $0x200] ss:$8 sps:$4 sm:$0xff]  }
  0x3a   :  { %v1608_v28 = vld [vmem:[#allocation2 + $0x2f4] ss:$8 sps:$4 sm:$0xff]   ;;  %v1606_v29 = vld [vmem:[#allocation2 + $0x2f0] ss:$8 sps:$4 sm:$0xff]   ;;  %v1637_v46 = vld [vmem:[#allocation5 + $0x38] sm:$0xff]   ;;  %vm1191_vm2 = vcmask 523264  }
  0x3b   :  { %709 = vmatpush1.bf16.msra.mxu0 %v1526_v30  ;;  %v1611_v30 = vld [vmem:[#allocation2 + $0x2e4] ss:$8 sps:$4 sm:$0xff]   ;;  %v1641_v50 = vld [vmem:[#allocation5 + $0x28] sm:$0xff]   ;;  %v1643_v52 = vld [vmem:[#allocation5 + $0x20] sm:$0xff]  }
  0x3c   :  { %710 = vmatprep.subr.bf16.mxu0 %v1530_v31  ;;  %750 = vmatpush1.bf16.msra.mxu1 %v1529_v32  ;;  %v1609_v31 = vld [vmem:[#allocation2 + $0x2e0] ss:$8 sps:$4 sm:$0xff]   ;;  %v1614_v32 = vld [vmem:[#allocation2 + $0x2d4] ss:$8 sps:$4 sm:$0xff]  }
  0x3d   :  { %751 = vmatprep.subr.bf16.mxu1 %v1533_v33  ;;  %v1612_v33 = vld [vmem:[#allocation2 + $0x2d0] ss:$8 sps:$4 sm:$0xff]   ;;  %v1639_v48 = vld [vmem:[#allocation5 + $0x30] sm:$0xff]  }
  0x3f   :  { %711 = vmatpush2.bf16.msra.mxu0 %v1532_v34  ;;  %v1617_v34 = vld [vmem:[#allocation2 + $0x2c4] ss:$8 sps:$4 sm:$0xff]  }
  0x40   :  { %712 = vmatprep.subr.bf16.mxu0 %v1536_v35  ;;  %752 = vmatpush2.bf16.msra.mxu1 %v1535_v36  ;;  %v1615_v35 = vld [vmem:[#allocation2 + $0x2c0] ss:$8 sps:$4 sm:$0xff]   ;;  %v1620_v36 = vld [vmem:[#allocation2 + $0x2b4] ss:$8 sps:$4 sm:$0xff]  }
  0x41   :  { %753 = vmatprep.subr.bf16.mxu1 %v1539_v37  ;;  %v1618_v37 = vld [vmem:[#allocation2 + $0x2b0] ss:$8 sps:$4 sm:$0xff]  }
  0x43   :  { %713 = vmatpush2.bf16.msra.mxu0 %v1538_v38  ;;  %v1623_v38 = vld [vmem:[#allocation2 + $0x2a4] ss:$8 sps:$4 sm:$0xff]  }
  0x44   :  { %714 = vmatprep.subr.bf16.mxu0 %v1542_v39  ;;  %754 = vmatpush2.bf16.msra.mxu1 %v1541_v40  ;;  %v1621_v39 = vld [vmem:[#allocation2 + $0x2a0] ss:$8 sps:$4 sm:$0xff]   ;;  %v1626_v40 = vld [vmem:[#allocation2 + $0x294] ss:$8 sps:$4 sm:$0xff]  }
  0x45   :  { %755 = vmatprep.subr.bf16.mxu1 %v1545_v41  ;;  %v1624_v41 = vld [vmem:[#allocation2 + $0x290] ss:$8 sps:$4 sm:$0xff]  }
  0x47   :  { %715 = vmatpush2.bf16.msra.mxu0 %v1544_v42  ;;  %v1632_v42 = vld [vmem:[#allocation2 + $0x284] ss:$8 sps:$4 sm:$0xff]  }
  0x48   :  { %716 = vmatprep.subr.bf16.mxu0 %v1548_v43  ;;  %756 = vmatpush2.bf16.msra.mxu1 %v1547_v44  ;;  %v1630_v43 = vld [vmem:[#allocation2 + $0x280] ss:$8 sps:$4 sm:$0xff]   ;;  %v1270_v44 = vcombine.low %v1809_v12, %v1809_v12 }
  0x49   :  { %757 = vmatprep.subr.bf16.mxu1 %v1551_v45  ;;  %v1636_v45 = vld [vmem:[#allocation5 + $0x78] sm:$0xff]  }
  0x4b   :  { %717 = vmatpush2.bf16.msra.mxu0 %v1550_v47  ;;  %v1638_v47 = vld [vmem:[#allocation5 + $0x70] sm:$0xff]  }
  0x4c   :  { %718 = vmatprep.subr.bf16.mxu0 %v1554_v49  ;;  %758 = vmatpush2.bf16.msra.mxu1 %v1553_v51  ;;  %v1640_v49 = vld [vmem:[#allocation5 + $0x68] sm:$0xff]   ;;  %v1642_v51 = vld [vmem:[#allocation5 + $0x60] sm:$0xff]  }
  0x4d   :  { %759 = vmatprep.subr.bf16.mxu1 %v1557_v53  ;;  %v1644_v53 = vld [vmem:[#allocation5 + $0x58] sm:$0xff]  }
  0x4f   :  { %719 = vmatpush2.bf16.msra.mxu0 %v1556_v54  ;;  %v1645_v54 = vld [vmem:[#allocation5 + $0x18] sm:$0xff]  }
  0x50   :  { %720 = vmatprep.subr.bf16.mxu0 %v1560_v55  ;;  %760 = vmatpush2.bf16.msra.mxu1 %v1559_v56  ;;  %v1646_v55 = vld [vmem:[#allocation5 + $0x50] sm:$0xff]  }
  0x51   :  { %761 = vmatprep.subr.bf16.mxu1 %v1563_v57  ;;  %v1647_v56 = vld [vmem:[#allocation5 + $0x10] sm:$0xff]   ;;  %v1648_v57 = vld [vmem:[#allocation5 + $0x48] sm:$0xff]  }
  0x53   :  { %721 = vmatpush2.bf16.msra.mxu0 %v1562_v58  ;;  %v1649_v58 = vld [vmem:[#allocation5 + $0x8] sm:$0xff]  }
  0x54   :  { %722 = vmatprep.subr.bf16.mxu0 %v1566_v59  ;;  %762 = vmatpush2.bf16.msra.mxu1 %v1565_v60  ;;  %v1650_v59 = vld [vmem:[#allocation5 + $0x40] sm:$0xff]  }
  0x55   :  { %763 = vmatprep.subr.bf16.mxu1 %v1569_v61  ;;  %v1651_v60 = vld [vmem:[#allocation5] sm:$0xff]   ;;  %v1741_v61 = vmov 0.0  }
  0x57   :  { %723 = vmatpush2.bf16.msra.mxu0 %v1568_v62 }
  0x58   :  { %724 = vmatprep.subr.bf16.mxu0 %v1572_v63  ;;  %764 = vmatpush2.bf16.msra.mxu1 %v1571_v0 }
  0x59   :  { %765 = vmatprep.subr.bf16.mxu1 %v1575_v1 }
  0x5b   :  { %725 = vmatpush2.bf16.msra.mxu0 %v1574_v2 }
  0x5c   :  { %776 = vmatprep.subr.bf16.mxu0 %v1582_v3  ;;  %766 = vmatpush2.bf16.msra.mxu1 %v1579_v4 }
  0x5d   :  { %831 = vmatprep.subr.bf16.mxu1 %v1629_v9 }
  0x5e   :  { %727 = vmatmul.mubr.bf16.vlgmr.msra.gmra.mxu0 %v1266_v5 }
  0x5f   :  { %777 = vmatpush1.bf16.msra.mxu0 %v1580_v6  ;;  %768 = vmatmul.mubr.bf16.vlgmr.msra.gmra.mxu1 %v1268_v7 }
  0x60   :  { %778 = vmatprep.subr.bf16.mxu0 %v1587_v8  ;;  %832 = vmatpush1.bf16.msra.mxu1 %v1627_v10  ;;  %v166_v10 = vlaneseq }
  0x61   :  { %849 = vmatprep.mubr.bf16.mxu1 %v1740_v16  ;;  %808 = vmatprep.mubr.bf16.mxu0 %v1271_v14 }
  0x62   :  { %1404 = vmatprep.subr.bf16.mxu1 %v1636_v45 }
  0x63   :  { %779 = vmatpush1.bf16.msra.mxu0 %v1585_v11  ;;  %v167_v11 = vshrl.u32 %v166_v10, 7 }
  0x64   :  { %780 = vmatprep.subr.bf16.mxu0 %v1590_v13  ;;  %v164_v13 = vld [vmem:[%s1888_s2] sm:$0x3] }
  0x65   :  { %v168_v12 = vsub.s32 0, %v167_v11  ;;  %v172_v14 = vsub.s32 1, %v167_v11 }
  0x67   :  { %781 = vmatpush1.bf16.msra.mxu0 %v1588_v15  ;;  %1371 = vmatmul.mubr.msk.bf16.vlgmr.msra.gmra.mxu1 %vm690_vm0, %v1633_v18  ;;  %v169_v15 = vrot.slane %v164_v13, %v168_v12  ;;  %v173_v16 = vrot.slane %v164_v13, %v172_v14 }
  0x68   :  { %782 = vmatprep.subr.bf16.mxu0 %v1593_v17  ;;  %1405 = vmatpush3.bf16.msra.mxu1 %v1637_v46 }
  0x69   :  { %1406 = vmatprep.subr.bf16.mxu1 %v1638_v47 }
  0x6b   :  { %783 = vmatpush1.bf16.msra.mxu0 %v1591_v19 }
  0x6c   :  { %784 = vmatprep.subr.bf16.mxu0 %v1596_v20  ;;  %1407 = vmatpush3.bf16.msra.mxu1 %v1639_v48 }
  0x6d   :  { %1408 = vmatprep.subr.bf16.mxu1 %v1640_v49 }
  0x6f   :  { %785 = vmatpush1.bf16.msra.mxu0 %v1594_v21 }
  0x70   :  { %786 = vmatprep.subr.bf16.mxu0 %v1599_v22  ;;  %1409 = vmatpush3.bf16.msra.mxu1 %v1641_v50 }
  0x71   :  { %1410 = vmatprep.subr.bf16.mxu1 %v1642_v51 }
  0x73   :  { %787 = vmatpush1.bf16.msra.mxu0 %v1597_v23 }
  0x74   :  { %788 = vmatprep.subr.bf16.mxu0 %v1602_v24  ;;  %1411 = vmatpush3.bf16.msra.mxu1 %v1643_v52  ;;  %v1662_v52 = vld [vmem:[%s1893_s7 + $0x8] sm:$0xff]  }
  0x75   :  { %1412 = vmatprep.subr.bf16.mxu1 %v1644_v53  ;;  %v1663_v53 = vld [vmem:[%s1893_s7] sm:$0xff]  }
  0x77   :  { %789 = vmatpush1.bf16.msra.mxu0 %v1600_v25 }
  0x78   :  { %790 = vmatprep.subr.bf16.mxu0 %v1605_v26  ;;  %1413 = vmatpush3.bf16.msra.mxu1 %v1645_v54  ;;  %v1389_v54 = vld [vmem:[%s1892_s6] ss:$0 sm:$0xff]  ;;  %s1743_s6 = smov [#allocation7]  }
  0x79   :  { %1414 = vmatprep.subr.bf16.mxu1 %v1646_v55 }
  0x7b   :  { %791 = vmatpush1.bf16.msra.mxu0 %v1603_v27 }
  0x7c   :  { %792 = vmatprep.subr.bf16.mxu0 %v1608_v28  ;;  %1415 = vmatpush3.bf16.msra.mxu1 %v1647_v56 }
  0x7d   :  { %1416 = vmatprep.subr.bf16.mxu1 %v1648_v57 }
  0x7f   :  { %793 = vmatpush2.bf16.msra.mxu0 %v1606_v29 }
  0x80   :  { %794 = vmatprep.subr.bf16.mxu0 %v1611_v30  ;;  %1417 = vmatpush3.bf16.msra.mxu1 %v1649_v58 }
  0x81   :  { %1418 = vmatprep.subr.bf16.mxu1 %v1650_v59 }
  0x83   :  { %795 = vmatpush2.bf16.msra.mxu0 %v1609_v31 }
  0x84   :  { %796 = vmatprep.subr.bf16.mxu0 %v1614_v32  ;;  %1419 = vmatpush3.bf16.msra.mxu1 %v1651_v60  ;;  %v1652_v32 = vld [vmem:[%s1891_s5 + $0x38] sm:$0xff]  }
  0x85   :  { %1440 = vmatprep.subr.bf16.mxu1 %v1741_v61 }
  0x87   :  { %797 = vmatpush2.bf16.msra.mxu0 %v1612_v33 }
  0x88   :  { %798 = vmatprep.subr.bf16.mxu0 %v1617_v34  ;;  %v1653_v34 = vld [vmem:[%s1891_s5 + $0x30] sm:$0xff]  }
  0x8b   :  { %799 = vmatpush2.bf16.msra.mxu0 %v1615_v35  ;;  %v1654_v35 = vld [vmem:[%s1891_s5 + $0x28] sm:$0xff]  }
  0x8c   :  { %800 = vmatprep.subr.bf16.mxu0 %v1620_v36  ;;  %v1655_v36 = vld [vmem:[%s1891_s5 + $0x20] sm:$0xff]  }
  0x8f   :  { %801 = vmatpush2.bf16.msra.mxu0 %v1618_v37  ;;  %v1656_v37 = vld [vmem:[%s1891_s5 + $0x18] sm:$0xff]  }
  0x90   :  { %802 = vmatprep.subr.bf16.mxu0 %v1623_v38  ;;  %v1657_v38 = vld [vmem:[%s1891_s5 + $0x10] sm:$0xff]  }
  0x93   :  { %803 = vmatpush2.bf16.msra.mxu0 %v1621_v39  ;;  %v1658_v39 = vld [vmem:[%s1891_s5 + $0x8] sm:$0xff]  }
  0x94   :  { %804 = vmatprep.subr.bf16.mxu0 %v1626_v40  ;;  %v1659_v40 = vld [vmem:[%s1891_s5] sm:$0xff]  }
  0x97   :  { %805 = vmatpush2.bf16.msra.mxu0 %v1624_v41  ;;  %v1660_v41 = vld [vmem:[%s1893_s7 + $0x18] sm:$0xff]  }
  0x98   :  { %806 = vmatprep.subr.bf16.mxu0 %v1632_v42  ;;  %v1661_v42 = vld [vmem:[%s1893_s7 + $0x10] sm:$0xff]   ;;  %s1256_s7 = sshll.u32 %s1743_s6, 4  ;;  %s1257_s7 = int_to_ptr.vmem [resolvable:$true] %s1256_s7 }
  0x99   :  { %p1713_p11 = scmp.lt.s32.totalorder %s1257_s7, %s1257_s7 }
  0x9b   :  { %807 = vmatpush2.bf16.msra.mxu0 %v1630_v43 }
  0x9c   :  { %1460 = vmatprep.subr.bf16.mxu0 %v1741_v61 }
  0x9e   :  { %809 = vmatmul.mubr.bf16.vlgmr.msra.gmra.mxu0 %v1270_v44  ;;  %v1372_v44 = vld [vmem:[%s1890_s4] ss:$0 sm:$0xff] }
  0x9f   :  { %1468 = vmatprep.mubr.msk.bf16.mxu0 %vm1742_vm1, %v1741_v61  ;;  %1461 = vmatpush3.bf16.msra.mxu0 %v1660_v41 }
  0xa0   :  { %1462 = vmatprep.subr.bf16.mxu0 %v1741_v61 }
  0xa3   :  { %1463 = vmatpush3.bf16.msra.mxu0 %v1661_v42 }
  0xa4   :  { %1464 = vmatprep.subr.bf16.mxu0 %v1741_v61 }
  0xa7   :  { %1465 = vmatpush3.bf16.msra.mxu0 %v1662_v52 }
  0xa8   :  { %1466 = vmatprep.subr.bf16.mxu0 %v1741_v61 }
  0xab   :  { %1467 = vmatpush3.bf16.msra.mxu0 %v1663_v53 }
 0x11e   :  { %v728_v62 = vpop.f32.mrf.mxu0 }
 0x11f   :  { %v769_v0 = vpop.f32.mrf.mxu1  ;;  %v729_v17 = vadd.f32 %v728_v62, %v169_v15 }
 0x120   :  { %v730_v63 = vpop.f32.mrf.mxu0 }
 0x121   :  { %v771_v2 = vpop.f32.mrf.mxu1  ;;  %v731_v18 = vadd.f32 %v730_v63, %v173_v16  ;;  %v770_v19 = vadd.f32 %v769_v0, %v729_v17  ;;  %v1398_v63 = vld [vmem:[%s1894_s8] ss:$0 sm:$0xff]  ;;  %s1708_s8 = scalar_lea.vmem %s1257_s7, 128 }
 0x122   :  { %v732_v1 = vpop.f32.mrf.mxu0  ;;  %p1709_p10 = scmp.ne.s32.totalorder %s1257_s7, %s1708_s8  ;;  %p1714_p12 = scmp.lt.s32.totalorder %s1708_s8, %s1708_s8 }
 0x123   :  { %v773_v4 = vpop.f32.mrf.mxu1  ;;  %v772_v21 = vadd.f32 %v771_v2, %v731_v18 }
 0x124   :  { %v733_v3 = vpop.f32.mrf.mxu0  ;;  %p1715_p13 = por %p1714_p12, %p1713_p11 }
 0x125   :  { %v774_v5 = vpop.f32.mrf.mxu1 }
 0x126   :  { %p1716_p0 = pnand %p1715_p13, %p1709_p10 }
 0x127   :  { %v851_v6 = vpop.f32.mrf.mxu1 }
 0x129   :  { %v853_v7 = vpop.f32.mrf.mxu1 }
 0x12b   :  { %v855_v8 = vpop.f32.mrf.mxu1 }
 0x12d   :  { %v856_v9 = vpop.f32.mrf.mxu1 }
 0x15e   :  { %v810_v20 = vpop.f32.mrf.mxu0 }
 0x15f   :  { %v811_v22 = vadd.f32 %v810_v20, %v770_v19 }
 0x160   :  { %v812_v23 = vpop.f32.mrf.mxu0 }
 0x161   :  { %v852_v24 = vadd.f32 %v851_v6, %v811_v22  ;;  %v813_v25 = vadd.f32 %v812_v23, %v772_v21 }
 0x162   :  { %v814_v26 = vpop.f32.mrf.mxu0 }
 0x163   :  { %v854_v27 = vadd.f32 %v853_v7, %v813_v25  ;;  %v858_v28 = vmax.f32 %v852_v24, 0.0 }
 0x164   :  { %v815_v29 = vpop.f32.mrf.mxu0 }
 0x165   :  { %v859_v30 = vmax.f32 %v854_v27, 0.0  ;;  %v860_v33 = vpack.c.bf16 %v858_v28, %v858_v28 }
 0x167   :  { %v861_v31 = vpack.c.bf16 %v859_v30, %v859_v30 }
 0x169   :  { %1029 = vmatprep.mubr.bf16.mxu1 %v861_v31 }
 0x16a   :  { %1030 = vmatmul.mubr.bf16.vlgmr.msra.gmra.mxu1 %v860_v33 }
 0x16b   :  { %1441 = vmatpush3.bf16.msra.mxu1 %v1652_v32  ;;  %1456 = vmatprep.mubr.msk.bf16.mxu1 %vm1742_vm1, %v1741_v61 }
 0x16c   :  { %1442 = vmatprep.subr.bf16.mxu1 %v1741_v61 }
 0x16f   :  { %1443 = vmatpush3.bf16.msra.mxu1 %v1653_v34 }
 0x170   :  { %1444 = vmatprep.subr.bf16.mxu1 %v1741_v61 }
 0x173   :  { %1445 = vmatpush3.bf16.msra.mxu1 %v1654_v35 }
 0x174   :  { %1446 = vmatprep.subr.bf16.mxu1 %v1741_v61 }
 0x177   :  { %1447 = vmatpush3.bf16.msra.mxu1 %v1655_v36 }
 0x178   :  { %1448 = vmatprep.subr.bf16.mxu1 %v1741_v61 }
 0x17b   :  { %1449 = vmatpush3.bf16.msra.mxu1 %v1656_v37 }
 0x17c   :  { %1450 = vmatprep.subr.bf16.mxu1 %v1741_v61 }
 0x17f   :  { %1451 = vmatpush3.bf16.msra.mxu1 %v1657_v38 }
 0x180   :  { %1452 = vmatprep.subr.bf16.mxu1 %v1741_v61 }
 0x183   :  { %1453 = vmatpush3.bf16.msra.mxu1 %v1658_v39 }
 0x184   :  { %1454 = vmatprep.subr.bf16.mxu1 %v1741_v61  ;;  %v1236_v61 = vand.u32 127, %v166_v10 }
 0x186   :  { %vm1237_vm3 = vcmp.lt.s32.totalorder %v1236_v61, 10 }
 0x187   :  { %1455 = vmatpush3.bf16.msra.mxu1 %v1659_v40 }
 0x22a   :  { %v1420_v43 = vpop.f32.mrf.mxu1 }
 0x22c   :  { %v1421_v45 = vpop.f32.mrf.mxu1 }
 0x22d   :  { %v1422_v46 = vadd.f32 %v1421_v45, %v1420_v43 }
 0x22e   :  { %v1423_v47 = vpop.f32.mrf.mxu1 }
 0x22f   :  { %v1032_v48 = vadd.f32 %v1422_v46, %v1372_v44 }
 0x230   :  { %v1424_v49 = vpop.f32.mrf.mxu1 }
 0x231   :  { %v1037_v50 = vmax.f32 %v1032_v48, 0.0 }
 0x233   :  { %v1038_v51 = vpack.c.bf16 %v1037_v50, %v1037_v50 }
 0x235   :  { %1457 = vmatmul.mubr.bf16.vlgmr.msra.gmra.mxu1 %v1038_v51 }
 0x2f5   :  { %v1144_v55 = vpop.f32.mrf.mxu1 }
 0x2f6   :  { %v1145_v56 = vadd.f32 %v1389_v54, %v1144_v55 }
 0x2f7   :  { %v1458_v57 = vpop.f32.mrf.mxu1 }
 0x2f8   :  { %v1150_v58 = vmax.f32 %v1145_v56, 0.0 }
 0x2f9   :  { %v1147_v59 = vpop.f32.mrf.mxu1 }
 0x2fa   :  { %v1151_v60 = vpack.c.bf16 %v1150_v58, %v1150_v58 }
 0x2fb   :  { %v1459_v62 = vpop.f32.mrf.mxu1 }
 0x2fc   :  { %1469 = vmatmul.mubr.msk.bf16.vlgmr.msra.gmra.mxu0 %vm1191_vm2, %v1151_v60 }
 0x3bc   :  { %v1229_v0 = vpop.f32.mrf.mxu0 }
 0x3bd   :  { %v1230_v1 = vadd.f32 %v1398_v63, %v1229_v0 }
 0x3be   :  { %v1470_v2 = vpop.f32.mrf.mxu0 }
 0x3bf   :  { %v1238_v3 = vsel %vm1237_vm3, %v1230_v1, -1e+30 }
 0x3c0   :  { %1239 = vmax.xlane.f32.xlu0 %v1238_v3  ;;  %v1232_v4 = vpop.f32.mrf.mxu0 }
 0x3c2   :  { %v1471_v5 = vpop.f32.mrf.mxu0 }
 0x449   :  { %v1240_v6 = vpop.xlane.xlu0 %1239 }
 0x44a   :  { %v1241_v7 = vsub.f32 %v1238_v3, %v1240_v6 }
 0x44c   :  { %v1242_v8 = vmul.f32 1.442695, %v1241_v7 }
 0x44e   :  { %1664 = vpow2.f32 %v1242_v8 }
 0x45b   :  { %v1665_v9 = vpop.eup %1664 }
 0x45c   :  { %1244 = vadd.xlane.f32.xlu0 %v1665_v9 }
 0x4e5   :  { %v1245_v11 = vpop.xlane.xlu0 %1244 }
 0x4e6   :  { %1666 = vlog2.f32 %v1245_v11 }
 0x4f3   :  { %v1667_v10 = vpop.eup %1666 }
 0x4f4   :  { %v1247_v12 = vmul.f32 0.6931472, %v1667_v10 }
 0x4f6   :  { %v1248_v13 = vsub.f32 %v1241_v7, %v1247_v12 }
 0x4f8   :  { %1249 = vst [vmem:[#allocation7] sm:$0xff] %v1248_v13 }
 0x4f9   :  { %1719 = shalt.err (!%p1716_p0)
}
 0x4fa   :  { %1259 = dma.vmem_to_hbm [thread:$0]  %s1257_s7, 128, %s1895_s9, [#allocation4]  }
 0x4fb   :  { %1732 = dma.done.wait [#allocation4], 128  }
 0x4fc   :  { %1733 = vsyncadd [#allocation4], 4294967168 }
 0x4fd   :  { %1263 = vsyncpa [#allocation3], 1 }
 0x4fe   :  { %1264 = vsyncpa [#allocation6], 1 }
 0x4ff   :  { %1265 = vsyncpa [#allocation4], 1 }

</bundles_post_ra>
